<compile_context>
chip_gen: v7x
topology: tpu7x:2x2x1
jax: 0.10.0
libtpu: 0.0.40
codegen_flags: <defaults>
</compile_context>

<pallas_src>
import functools

import jax
import jax.numpy as jnp
from jax.experimental import pallas as pl
from jax.experimental.pallas import tpu as pltpu


def _ensemble_lora_kernel(x_ref, w0t_ref, at_ref, bt_ref, o_ref, xa_ref, *, gate_down):
    """Fused ensemble-LoRA forward.

    Grid = (batch tiles i, OUT tiles j, IN/K tiles k); k is the reduction axis
    (innermost). The output tile is resident across k and accumulated in f32.
    xa_ref (VMEM scratch) holds the small (tm, NR) down-projection x @ A_cat.T.
    When gate_down, it is computed only on the first OUT tile (j == 0) and re-used
    for every j > 0 of the same batch tile (scratch persists across grid steps;
    the OUT axis is then serial, so this is megacore-safe).
    """
    j = pl.program_id(1)
    k = pl.program_id(2)
    nk = pl.num_programs(2)

    @pl.when(k == 0)
    def _init_out():
        o_ref[...] = jnp.zeros_like(o_ref)

    x = x_ref[...]                                                   # (tm, tk) bf16
    # Base path: ensemble weights already folded in (W0 pre-scaled by sum(w)).
    o_ref[...] += jnp.dot(x, w0t_ref[...], preferred_element_type=jnp.float32)

    def _down_proj():
        @pl.when(k == 0)
        def _init_xa():
            xa_ref[...] = jnp.zeros_like(xa_ref)
        xa_ref[...] += jnp.dot(x, at_ref[...], preferred_element_type=jnp.float32)

    if gate_down:
        pl.when(j == 0)(_down_proj)      # compute once per (i, k); reuse for j > 0
    else:
        _down_proj()

    @pl.when(k == nk - 1)
    def _finish():
        # Up-projection; per-adapter ensemble weights are pre-folded into B_cat.
        # (xa accumulated in f32, cast to bf16 for the MXU — fine for stated tolerance.)
        o_ref[...] += jnp.dot(xa_ref[...].astype(bt_ref.dtype), bt_ref[...],
                              preferred_element_type=jnp.float32)


def _choose_tile(dim, target, align):
    """Return (tile, padded_dim).

    tile is `align`-aligned (or the whole padded dim when dim <= target), divides
    padded_dim, and padded_dim >= dim with minimal padding. Never falls back to an
    oversized full-dim tile when dim > target (pads instead)."""
    if dim <= target:
        padded = -(-dim // align) * align
        return padded, padded
    t = (target // align) * align
    cand = t
    while cand >= align:
        if dim % cand == 0:
            return cand, dim
        cand -= align
    padded = -(-dim // t) * t
    return t, padded


def _plan_tiles(b, out, inp, nr, tm_t, tn_t, tk_t, vmem_budget):
    """Pick (tm, Bp, tn, OUTp, tk, INp) under a v7x-safe double-buffered VMEM budget."""
    while True:
        tm, bp = _choose_tile(b, tm_t, 16)                           # bf16 sublane packing
        tn, outp = _choose_tile(out, tn_t, 256 if out % 256 == 0 else 128)  # MXU width
        tk, inp_p = _choose_tile(inp, tk_t, 256 if inp % 256 == 0 else 128)
        # double-buffered bf16 inputs + double-buffered f32 output + f32 xa scratch
        vmem = (2 * (tm * tk + tk * tn + tk * nr + nr * tn) * 2
                + 2 * tm * tn * 4 + tm * nr * 4)
        if vmem <= vmem_budget or (tk_t <= 256 and tn_t <= 256 and tm_t <= 64):
            return tm, bp, tn, outp, tk, inp_p
        if tk_t >= tn_t and tk_t > 256:
            tk_t //= 2
        elif tn_t > 256:
            tn_t //= 2
        else:
            tm_t //= 2


def _tensorcores_per_chip():
    """v7x is the only generation with 2 TCs; it is also the only one with 64 MiB
    (vs 128 MiB) VMEM per core, which get_tpu_info exposes. Conservative fallback."""
    try:
        return 2 if pltpu.get_tpu_info().vmem_capacity_bytes < (100 << 20) else 1
    except Exception:
        return 2


def ensemble_lora_forward(x, w0, a_stack, b_stack, weights, *,
                          tm_target=512, tn_target=1024, tk_target=2048):
    """x: (B, IN) f32, w0: (OUT, IN), a_stack: (N, R, IN), b_stack: (N, OUT, R),
    weights: (N,) f32.  Returns (B, OUT) f32."""
    B, IN = x.shape
    OUT = w0.shape[0]
    N, R, _ = a_stack.shape
    weights = weights.astype(jnp.float32)

    # ---- one-time wrapper-side preprocessing (plain XLA ops) -------------------
    # Base path hoisted: sum_a w_a * (x @ W0.T) == x @ (sum(w) * W0).T
    w0t = (jnp.sum(weights) * w0.astype(jnp.float32)).T.astype(jnp.bfloat16)      # (IN, OUT)
    # LoRA ensemble collapsed along the rank/contraction dim.
    a_cat_t = a_stack.reshape(N * R, IN).T.astype(jnp.bfloat16)                   # (IN, N*R)
    b_cat = (weights[:, None, None] * jnp.transpose(b_stack, (0, 2, 1))
             ).reshape(N * R, OUT).astype(jnp.bfloat16)                           # (N*R, OUT)
    xb = x.astype(jnp.bfloat16)

    # Rank dim 16-aligned (bf16 packs 16 rows per packed vreg) — NOT padded to 128.
    NR = N * R
    nr_pad = (-NR) % 16
    if nr_pad:
        a_cat_t = jnp.pad(a_cat_t, ((0, 0), (0, nr_pad)))
        b_cat = jnp.pad(b_cat, ((0, nr_pad), (0, 0)))
    NRp = NR + nr_pad

    # Tile plan under a 40 MiB budget (safe on v7x's 64 MiB/TC; trivially fits v5e/v6e).
    tm, Bp, tn, OUTp, tk, INp = _plan_tiles(
        B, OUT, IN, NRp, tm_target, tn_target, tk_target, vmem_budget=40 * 1024 * 1024)

    if Bp != B or INp != IN:
        xb = jnp.pad(xb, ((0, Bp - B), (0, INp - IN)))
    if INp != IN or OUTp != OUT:
        w0t = jnp.pad(w0t, ((0, INp - IN), (0, OUTp - OUT)))
    if INp != IN:
        a_cat_t = jnp.pad(a_cat_t, ((0, INp - IN), (0, 0)))
    if OUTp != OUT:
        b_cat = jnp.pad(b_cat, ((0, 0), (0, OUTp - OUT)))

    gi, gj, gk = Bp // tm, OUTp // tn, INp // tk

    # Gate the down-projection to j == 0 only when it saves MXU work (gj > 1) and we do
    # not have to give up megacore for it: gating forces the OUT axis serial (xa_ref is
    # per-core scratch), so on a 2-TC chip with gi == 1 prefer keeping OUT "parallel"
    # and recomputing the tiny xa per OUT tile instead.
    multi_core = _tensorcores_per_chip() > 1
    gate_down = gj > 1 and (gi > 1 or not multi_core)
    dim_sem = ("parallel",
               "arbitrary" if gate_down else "parallel",
               "arbitrary")

    grid_spec = pltpu.PrefetchScalarGridSpec(
        num_scalar_prefetch=0,
        grid=(gi, gj, gk),
        in_specs=[
            pl.BlockSpec((tm, tk), lambda i, j, k: (i, k)),     # x
            pl.BlockSpec((tk, tn), lambda i, j, k: (k, j)),     # (sum(w) * W0).T
            pl.BlockSpec((tk, NRp), lambda i, j, k: (k, 0)),    # A_cat.T
            pl.BlockSpec((NRp, tn), lambda i, j, k: (0, j)),    # weighted B_cat
        ],
        out_specs=pl.BlockSpec((tm, tn), lambda i, j, k: (i, j)),
        scratch_shapes=[pltpu.VMEM((tm, NRp), jnp.float32)],    # x @ A_cat.T accumulator
    )

    flops = 2 * Bp * INp * (OUTp + NRp) + 2 * Bp * NRp * OUTp
    bytes_accessed = (2 * (Bp * INp + INp * OUTp + INp * NRp + NRp * OUTp)
                      + 4 * Bp * OUTp)
    cost = pl.CostEstimate(flops=flops, transcendentals=0, bytes_accessed=bytes_accessed)

    out = pl.pallas_call(
        functools.partial(_ensemble_lora_kernel, gate_down=gate_down),
        out_shape=jax.ShapeDtypeStruct((Bp, OUTp), jnp.float32),
        grid_spec=grid_spec,
        compiler_params=pltpu.CompilerParams(
            dimension_semantics=dim_sem,
            vmem_limit_bytes=48 * 1024 * 1024,   # below v7x's 64 MiB/TC physical VMEM
        ),
        cost_estimate=cost,
    )(xb, w0t, a_cat_t, b_cat)

    if Bp != B or OUTp != OUT:
        out = out[:B, :OUT]
    return out


if __name__ == "__main__":
    # Small shapes: batch=8, hidden_in=128, hidden_out=128, lora rank=8, 3 adapters.
    B, IN, OUT, R, N = 8, 128, 128, 8, 3

    key = jax.random.PRNGKey(0)
    kx, kw0, ka, kb = jax.random.split(key, 4)
    x = jax.random.normal(kx, (B, IN), dtype=jnp.float32)
    w0 = jax.random.normal(kw0, (OUT, IN), dtype=jnp.float32) * 0.05
    a_stack = jax.random.normal(ka, (N, R, IN), dtype=jnp.float32) * 0.05
    b_stack = jax.random.normal(kb, (N, OUT, R), dtype=jnp.float32) * 0.05
    weights = jnp.array([0.5, 0.3, 0.2], dtype=jnp.float32)   # per-adapter ensemble weights

    out = ensemble_lora_forward(x, w0, a_stack, b_stack, weights)
    out = jax.block_until_ready(out)

    # Plain-JAX f32 reference of EnsembleLoRAModule.forward with the synthetic base model.
    base = x @ w0.T
    adapter_outs = jnp.stack(
        [base + (x @ a_stack[i].T) @ b_stack[i].T for i in range(N)], axis=0
    )                                                     # (N, B, OUT)
    ref = (adapter_outs * weights[:, None, None]).sum(axis=0)

    assert out.shape == (B, OUT) and out.dtype == jnp.float32
    max_err = float(jnp.max(jnp.abs(out - ref)))
    # Kernel uses bf16 matmul inputs with f32 accumulation -> loose tolerance vs f32 ref.
    assert jnp.allclose(out, ref, atol=5e-2, rtol=5e-2), f"max abs err {max_err}"
    print("KERNEL_OK")
</pallas_src>

<mosaic_0001>
module attributes {stable_mosaic.version = 11 : i64} {
  func.func @_ensemble_lora_kernel(%arg0: i32, %arg1: i32, %arg2: i32, %arg3: memref<16x128xbf16, #tpu.memory_space<vmem>>, %arg4: memref<128x128xbf16, #tpu.memory_space<vmem>>, %arg5: memref<128x32xbf16, #tpu.memory_space<vmem>>, %arg6: memref<32x128xbf16, #tpu.memory_space<vmem>>, %arg7: memref<16x128xf32, #tpu.memory_space<vmem>>, %arg8: memref<16x32xf32, #tpu.memory_space<vmem>>) attributes {dimension_semantics = [#tpu.dimension_semantics<parallel>, #tpu.dimension_semantics<parallel>, #tpu.dimension_semantics<arbitrary>], iteration_bounds = array<i64: 1, 1, 1>, scalar_prefetch = 0 : i64, scratch_operands = 1 : i64, tpu.core_type = #tpu.core_type<tc>, window_params = [{transform_indices = @transform_0, window_bounds = array<i64: 16, 128>}, {transform_indices = @transform_1, window_bounds = array<i64: 128, 128>}, {transform_indices = @transform_2, window_bounds = array<i64: 128, 32>}, {transform_indices = @transform_3, window_bounds = array<i64: 32, 128>}, {transform_indices = @transform_4, window_bounds = array<i64: 16, 128>}]} {
    %c0_i32 = arith.constant 0 : i32
    %0 = arith.cmpi eq, %arg2, %c0_i32 : i32
    %1 = arith.extui %0 : i1 to i32
    %c0_i32_0 = arith.constant 0 : i32
    %2 = arith.cmpi ne, %1, %c0_i32_0 : i32
    scf.if %2 {
      %cst_19 = arith.constant 0.000000e+00 : f32
      %20 = vector.broadcast %cst_19 : f32 to vector<16x128xf32>
      %c0_20 = arith.constant 0 : index
      %c0_21 = arith.constant 0 : index
      %21 = vector.load %arg7[%c0_20, %c0_21] : memref<16x128xf32, #tpu.memory_space<vmem>>, vector<16x128xf32>
      tpu.vector_store %arg7[%c0_20, %c0_21], %20 {strides = array<i32>} : memref<16x128xf32, #tpu.memory_space<vmem>>, vector<16x128xf32>,
    } else {
    }
    %c0 = arith.constant 0 : index
    %c0_1 = arith.constant 0 : index
    %3 = vector.load %arg3[%c0, %c0_1] : memref<16x128xbf16, #tpu.memory_space<vmem>>, vector<16x128xbf16>
    %c0_2 = arith.constant 0 : index
    %c0_3 = arith.constant 0 : index
    %4 = vector.load %arg7[%c0_2, %c0_3] : memref<16x128xf32, #tpu.memory_space<vmem>>, vector<16x128xf32>
    %c0_4 = arith.constant 0 : index
    %c0_5 = arith.constant 0 : index
    %5 = vector.load %arg4[%c0_4, %c0_5] : memref<128x128xbf16, #tpu.memory_space<vmem>>, vector<128x128xbf16>
    %cst = arith.constant dense<0.000000e+00> : vector<16x128xf32>
    %6 = tpu.matmul %3, %5, %cst {dimension_numbers = #tpu.dot_dimension_numbers<[1], [0], [0], [1], [0, 0, 1, 1], [], []>} : vector<16x128xbf16>, vector<128x128xbf16>, vector<16x128xf32> -> vector<16x128xf32>
    %7 = arith.addf %4, %6 : vector<16x128xf32>
    %c0_6 = arith.constant 0 : index
    %c0_7 = arith.constant 0 : index
    %8 = vector.load %arg7[%c0_6, %c0_7] : memref<16x128xf32, #tpu.memory_space<vmem>>, vector<16x128xf32>
    tpu.vector_store %arg7[%c0_6, %c0_7], %7 {strides = array<i32>} : memref<16x128xf32, #tpu.memory_space<vmem>>, vector<16x128xf32>,
    %c0_i32_8 = arith.constant 0 : i32
    %9 = arith.cmpi eq, %arg2, %c0_i32_8 : i32
    %10 = arith.extui %9 : i1 to i32
    %c0_i32_9 = arith.constant 0 : i32
    %11 = arith.cmpi ne, %10, %c0_i32_9 : i32
    scf.if %11 {
      %cst_19 = arith.constant 0.000000e+00 : f32
      %20 = vector.broadcast %cst_19 : f32 to vector<16x32xf32>
      %c0_20 = arith.constant 0 : index
      %c0_21 = arith.constant 0 : index
      %21 = vector.load %arg8[%c0_20, %c0_21] : memref<16x32xf32, #tpu.memory_space<vmem>>, vector<16x32xf32>
      tpu.vector_store %arg8[%c0_20, %c0_21], %20 {strides = array<i32>} : memref<16x32xf32, #tpu.memory_space<vmem>>, vector<16x32xf32>,
    } else {
    }
    %c0_10 = arith.constant 0 : index
    %c0_11 = arith.constant 0 : index
    %12 = vector.load %arg8[%c0_10, %c0_11] : memref<16x32xf32, #tpu.memory_space<vmem>>, vector<16x32xf32>
    %c0_12 = arith.constant 0 : index
    %c0_13 = arith.constant 0 : index
    %13 = vector.load %arg5[%c0_12, %c0_13] : memref<128x32xbf16, #tpu.memory_space<vmem>>, vector<128x32xbf16>
    %cst_14 = arith.constant dense<0.000000e+00> : vector<16x32xf32>
    %14 = tpu.matmul %3, %13, %cst_14 {dimension_numbers = #tpu.dot_dimension_numbers<[1], [0], [0], [1], [0, 0, 1, 1], [], []>} : vector<16x128xbf16>, vector<128x32xbf16>, vector<16x32xf32> -> vector<16x32xf32>
    %15 = arith.addf %12, %14 : vector<16x32xf32>
    %c0_15 = arith.constant 0 : index
    %c0_16 = arith.constant 0 : index
    %16 = vector.load %arg8[%c0_15, %c0_16] : memref<16x32xf32, #tpu.memory_space<vmem>>, vector<16x32xf32>
    tpu.vector_store %arg8[%c0_15, %c0_16], %15 {strides = array<i32>} : memref<16x32xf32, #tpu.memory_space<vmem>>, vector<16x32xf32>,
    %c0_i32_17 = arith.constant 0 : i32
    %17 = arith.cmpi eq, %arg2, %c0_i32_17 : i32
    %18 = arith.extui %17 : i1 to i32
    %c0_i32_18 = arith.constant 0 : i32
    %19 = arith.cmpi ne, %18, %c0_i32_18 : i32
    scf.if %19 {
      %c0_19 = arith.constant 0 : index
      %c0_20 = arith.constant 0 : index
      %20 = vector.load %arg7[%c0_19, %c0_20] : memref<16x128xf32, #tpu.memory_space<vmem>>, vector<16x128xf32>
      %c0_21 = arith.constant 0 : index
      %c0_22 = arith.constant 0 : index
      %21 = vector.load %arg8[%c0_21, %c0_22] : memref<16x32xf32, #tpu.memory_space<vmem>>, vector<16x32xf32>
      %22 = arith.truncf %21 : vector<16x32xf32> to vector<16x32xbf16>
      %c0_23 = arith.constant 0 : index
      %c0_24 = arith.constant 0 : index
      %23 = vector.load %arg6[%c0_23, %c0_24] : memref<32x128xbf16, #tpu.memory_space<vmem>>, vector<32x128xbf16>
      %cst_25 = arith.constant dense<0.000000e+00> : vector<16x128xf32>
      %24 = tpu.matmul %22, %23, %cst_25 {dimension_numbers = #tpu.dot_dimension_numbers<[1], [0], [0], [1], [0, 0, 1, 1], [], []>} : vector<16x32xbf16>, vector<32x128xbf16>, vector<16x128xf32> -> vector<16x128xf32>
      %25 = arith.addf %20, %24 : vector<16x128xf32>
      %c0_26 = arith.constant 0 : index
      %c0_27 = arith.constant 0 : index
      %26 = vector.load %arg7[%c0_26, %c0_27] : memref<16x128xf32, #tpu.memory_space<vmem>>, vector<16x128xf32>
      tpu.vector_store %arg7[%c0_26, %c0_27], %25 {strides = array<i32>} : memref<16x128xf32, #tpu.memory_space<vmem>>, vector<16x128xf32>,
    } else {
    }
    return
  }
  func.func @transform_0(%arg0: i32, %arg1: i32, %arg2: i32) -> (i32, i32) {
    %c0_i32 = arith.constant 0 : i32
    return %arg0, %arg2 : i32, i32
  }
  func.func @transform_1(%arg0: i32, %arg1: i32, %arg2: i32) -> (i32, i32) {
    %c0_i32 = arith.constant 0 : i32
    return %arg2, %arg1 : i32, i32
  }
  func.func @transform_2(%arg0: i32, %arg1: i32, %arg2: i32) -> (i32, i32) {
    %c0_i32 = arith.constant 0 : i32
    %c0_i32_0 = arith.constant 0 : i32
    return %arg2, %c0_i32 : i32, i32
  }
  func.func @transform_3(%arg0: i32, %arg1: i32, %arg2: i32) -> (i32, i32) {
    %c0_i32 = arith.constant 0 : i32
    %c0_i32_0 = arith.constant 0 : i32
    return %c0_i32, %arg1 : i32, i32
  }
  func.func @transform_4(%arg0: i32, %arg1: i32, %arg2: i32) -> (i32, i32) {
    %c0_i32 = arith.constant 0 : i32
    return %arg0, %arg1 : i32, i32
  }
}

</mosaic_0001>

<bundles_post_ra>
// kernel: tpu_custom_call.1
= control target key start
LH: loop header
LB: loop body
LE: loop exit
PB: predicated region body
PF: predicated region fallthrough
CT: control target
= control target key end

     0   :  { %9 = vsyncpa [#allocation4], 0  ;;  %s658_s0 = inlined_call_operand.hbm [shape: bf16[16,128], index: 0, kind: input, shape index: {}]   ;;  %s659_s1 = inlined_call_operand.vmem [shape: bf16[128,128], index: 1, kind: input, shape index: {}]   ;;  %s660_s2 = inlined_call_operand.vmem [shape: bf16[128,32], index: 2, kind: input, shape index: {}]   ;;  %s661_s3 = inlined_call_operand.vmem [shape: bf16[32,128], index: 3, kind: input, shape index: {}]   ;;  %s662_s4 = inlined_call_operand.hbm [shape: f32[16,128], index: 4, kind: output, shape index: {}]  }
   0x1   :  { %10 = vsyncpa [#allocation5], 0  ;;  %s539_s15 = smov [#allocation3]   ;;  %s491_s19 = scalar_lea.hbm %s658_s0, 128 }
   0x2   :  { %s16_s16 = sshll.u32 %s539_s15, 4  ;;  %p492_p0 = scmp.ne.s32.totalorder %s658_s0, %s491_s19  ;;  %s17_s16 = int_to_ptr.vmem [resolvable:$true] %s16_s16 }
   0x3   :  { %p495_p1 = scmp.lt.u32.totalorder %s491_s19, %s658_s0 }
   0x5   :  { %p497_p2 = pnand %p495_p1, %p492_p0 }
   0x7   :  { %500 = shalt.err (!%p497_p2)
}
   0x8   :  { %s501_s24 = scalar_lea.vmem %s17_s16, 128  ;;  %p506_p4 = scmp.lt.s32.totalorder %s17_s16, %s17_s16 }
   0x9   :  { %p502_p3 = scmp.ne.s32.totalorder %s17_s16, %s501_s24  ;;  %p507_p5 = scmp.lt.s32.totalorder %s501_s24, %s501_s24 }
   0xb   :  { %p508_p6 = por %p507_p5, %p506_p4 }
   0xd   :  { %p509_p7 = pnand %p508_p6, %p502_p3 }
   0xf   :  { %512 = shalt.err (!%p509_p7)
}
  0x10   :  { %s540_s25 = smov 64   ;;  %s541_s26 = smov 4  }
  0x11   :  { %22 = dma.hbm_to_vmem [thread:$0]  %s658_s0, 128, %s17_s16, [#allocation4], %s540_s25, %s540_s25, %s541_s26  }
  0x12   :  { %535 = dma.done.wait [#allocation4], 128  }
  0x13   :  { %536 = vsyncadd [#allocation4], 4294967168  ;;  %vm161_vm0 = vcmask 261120   ;;  %v542_v0 = vmov 0.0   ;;  %vm543_vm1 = vmmov 0   ;;  %v472_v1 = vld [vmem:[%s660_s2] sm:$0xff]  }
  0x14   :  { %426 = vmatprep.subr.bf16.mxu1 %v542_v0  ;;  %442 = vmatprep.mubr.msk.bf16.mxu1 %vm543_vm1, %v542_v0  ;;  %162 = vst.msk [vmem:[#allocation2] sm:$0xff] %vm161_vm0, %v542_v0  ;;  %163 = vst.msk [vmem:[#allocation2 + $0x8] sm:$0xff] %vm161_vm0, %v542_v0  ;;  %v473_v2 = vld [vmem:[%s660_s2 + $0x8] sm:$0xff]   ;;  %v474_v3 = vld [vmem:[%s660_s2 + $0x10] sm:$0xff]  }
  0x15   :  { %406 = vmatprep.subr.bf16.mxu0 %v542_v0  ;;  %422 = vmatprep.mubr.msk.bf16.mxu0 %vm543_vm1, %v542_v0  ;;  %v481_v4 = vld [vmem:[%s659_s1] sm:$0xff]   ;;  %v475_v5 = vld [vmem:[%s660_s2 + $0x18] sm:$0xff]   ;;  %v482_v6 = vld [vmem:[%s659_s1 + $0x8] sm:$0xff]  }
  0x16   :  { %427 = vmatpush3.bf16.msra.mxu1 %v472_v1  ;;  %407 = vmatpush3.bf16.msra.mxu0 %v481_v4  ;;  %v476_v7 = vld [vmem:[%s660_s2 + $0x20] sm:$0xff]   ;;  %v483_v8 = vld [vmem:[%s659_s1 + $0x10] sm:$0xff]   ;;  %v477_v9 = vld [vmem:[%s660_s2 + $0x28] sm:$0xff]  }
  0x17   :  { %428 = vmatprep.subr.bf16.mxu1 %v542_v0  ;;  %408 = vmatprep.subr.bf16.mxu0 %v542_v0  ;;  %v484_v10 = vld [vmem:[%s659_s1 + $0x18] sm:$0xff]   ;;  %v478_v11 = vld [vmem:[%s660_s2 + $0x30] sm:$0xff]   ;;  %v485_v12 = vld [vmem:[%s659_s1 + $0x20] sm:$0xff]  }
  0x18   :  { %v479_v13 = vld [vmem:[%s660_s2 + $0x38] sm:$0xff]   ;;  %v486_v14 = vld [vmem:[%s659_s1 + $0x28] sm:$0xff]   ;;  %v480_v15 = vld [vmem:[#allocation3] sm:$0xff]  }
  0x19   :  { %v487_v16 = vld [vmem:[%s659_s1 + $0x30] sm:$0xff]   ;;  %v488_v17 = vld [vmem:[%s659_s1 + $0x38] sm:$0xff]   ;;  %v489_v18 = vld [vmem:[%s661_s3] sm:$0xff]   ;;  %s544_s1 = smov [#allocation6]  }
  0x1a   :  { %429 = vmatpush3.bf16.msra.mxu1 %v473_v2  ;;  %409 = vmatpush3.bf16.msra.mxu0 %v482_v6  ;;  %v490_v19 = vld [vmem:[%s661_s3 + $0x8] sm:$0xff]   ;;  %s353_s3 = sshll.u32 %s544_s1, 4  ;;  %s354_s3 = int_to_ptr.vmem [resolvable:$true] %s353_s3 }
  0x1b   :  { %430 = vmatprep.subr.bf16.mxu1 %v542_v0  ;;  %410 = vmatprep.subr.bf16.mxu0 %v542_v0  ;;  %v164_v20 = vld [vmem:[#allocation2] sm:$0xff]  ;;  %v165_v22 = vld [vmem:[#allocation2 + $0x8] sm:$0xff]  ;;  %s513_s10 = scalar_lea.vmem %s354_s3, 256  ;;  %p518_p9 = scmp.lt.s32.totalorder %s354_s3, %s354_s3 }
  0x1c   :  { %p514_p8 = scmp.ne.s32.totalorder %s354_s3, %s513_s10  ;;  %p519_p10 = scmp.lt.s32.totalorder %s513_s10, %s513_s10 }
  0x1e   :  { %431 = vmatpush3.bf16.msra.mxu1 %v474_v3  ;;  %411 = vmatpush3.bf16.msra.mxu0 %v483_v8  ;;  %p520_p11 = por %p519_p10, %p518_p9 }
  0x1f   :  { %432 = vmatprep.subr.bf16.mxu1 %v542_v0  ;;  %412 = vmatprep.subr.bf16.mxu0 %v542_v0 }
  0x20   :  { %p521_p12 = pnand %p520_p11, %p514_p8 }
  0x22   :  { %433 = vmatpush3.bf16.msra.mxu1 %v475_v5  ;;  %413 = vmatpush3.bf16.msra.mxu0 %v484_v10 }
  0x23   :  { %434 = vmatprep.subr.bf16.mxu1 %v542_v0  ;;  %414 = vmatprep.subr.bf16.mxu0 %v542_v0 }
  0x26   :  { %435 = vmatpush3.bf16.msra.mxu1 %v476_v7  ;;  %415 = vmatpush3.bf16.msra.mxu0 %v485_v12 }
  0x27   :  { %436 = vmatprep.subr.bf16.mxu1 %v542_v0  ;;  %416 = vmatprep.subr.bf16.mxu0 %v542_v0 }
  0x2a   :  { %437 = vmatpush3.bf16.msra.mxu1 %v477_v9  ;;  %417 = vmatpush3.bf16.msra.mxu0 %v486_v14 }
  0x2b   :  { %438 = vmatprep.subr.bf16.mxu1 %v542_v0  ;;  %418 = vmatprep.subr.bf16.mxu0 %v542_v0 }
  0x2e   :  { %439 = vmatpush3.bf16.msra.mxu1 %v478_v11  ;;  %419 = vmatpush3.bf16.msra.mxu0 %v487_v16 }
  0x2f   :  { %440 = vmatprep.subr.bf16.mxu1 %v542_v0  ;;  %420 = vmatprep.subr.bf16.mxu0 %v542_v0 }
  0x32   :  { %441 = vmatpush3.bf16.msra.mxu1 %v479_v13  ;;  %421 = vmatpush3.bf16.msra.mxu0 %v488_v17 }
  0x33   :  { %446 = vmatprep.subr.bf16.mxu0 %v542_v0 }
  0x35   :  { %443 = vmatmul.mubr.bf16.vlgmr.msra.gmra.mrb[0].mxu1 %v480_v15  ;;  %423 = vmatmul.mubr.bf16.vlgmr.msra.gmra.mrb[0].mxu0 %v480_v15 }
  0x36   :  { %450 = vmatprep.mubr.msk.bf16.mxu0 %vm543_vm1, %v542_v0  ;;  %447 = vmatpush3.bf16.msra.mxu0 %v489_v18 }
  0x37   :  { %448 = vmatprep.subr.bf16.mxu0 %v542_v0 }
  0x3a   :  { %449 = vmatpush3.bf16.msra.mxu0 %v490_v19 }
 0x108   :  { %v264_v21 = vpop.f32.mrb[0].mxu1 }
 0x109   :  { %v271_v23 = vadd.f32 %v264_v21, %v164_v20  ;;  %v444_v24 = vpop.f32.mrb[1].mxu1 }
 0x10a   :  { %v267_v25 = vpop.f32.mrb[2].mxu1 }
 0x10b   :  { %274 = vst.msk [vmem:[#allocation2] sm:$0xff] %vm161_vm0, %v271_v23  ;;  %v272_v26 = vadd.f32 %v267_v25, %v165_v22  ;;  %v445_v27 = vpop.f32.mrb[3].mxu1 }
 0x10d   :  { %275 = vst.msk [vmem:[#allocation2 + $0x8] sm:$0xff] %vm161_vm0, %v272_v26 }
 0x112   :  { %v281_v28 = vld [vmem:[#allocation2] sm:$0xff] }
 0x114   :  { %v282_v29 = vld [vmem:[#allocation2 + $0x8] sm:$0xff] }
 0x115   :  { %v283_v30 = vpack.c.bf16 %v282_v29, %v281_v28 }
 0x117   :  { %451 = vmatmul.mubr.msk.bf16.vlgmr.msra.gmra.mrb[0].mxu0 %vm161_vm0, %v283_v30 }
 0x1ea   :  { %v337_v31 = vpop.f32.mrb[0].mxu0 }
 0x1eb   :  { %v452_v32 = vpop.f32.mrb[1].mxu0  ;;  %346 = vst [vmem:[#allocation6] sm:$0xff] %v337_v31 }
 0x1ec   :  { %v340_v33 = vpop.f32.mrb[2].mxu0 }
 0x1ed   :  { %v453_v34 = vpop.f32.mrb[3].mxu0  ;;  %347 = vst [vmem:[#allocation6 + $0x8] sm:$0xff] %v340_v33 }
 0x1ee   :  { %524 = shalt.err (!%p521_p12)
}
 0x1ef   :  { %s525_s13 = scalar_lea.hbm %s662_s4, 256 }
 0x1f0   :  { %p526_p13 = scmp.ne.s32.totalorder %s662_s4, %s525_s13  ;;  %p529_p0 = scmp.lt.u32.totalorder %s525_s13, %s662_s4 }
 0x1f2   :  { %p531_p1 = pnand %p529_p0, %p526_p13 }
 0x1f4   :  { %534 = shalt.err (!%p531_p1)
}
 0x1f5   :  { %s545_s18 = smov 128   ;;  %s546_s19 = smov 8  }
 0x1f6   :  { %359 = dma.vmem_to_hbm [thread:$0]  %s354_s3, 256, %s662_s4, [#allocation5], %s545_s18, %s545_s18, %s546_s19  }
 0x1f7   :  { %537 = dma.done.wait [#allocation5], 256  }
 0x1f8   :  { %538 = vsyncadd [#allocation5], 4294967040 }
 0x1f9   :  { %363 = vsyncpa [#allocation4], 1 }
 0x1fa   :  { %364 = vsyncpa [#allocation5], 1 }

</bundles_post_ra>
